<compile_context>
chip_gen: v7x
topology: tpu7x:2x2x1
jax: 0.10.0
libtpu: 0.0.40
codegen_flags: <defaults>
</compile_context>

<pallas_src>
import functools

import numpy as np
import jax
import jax.numpy as jnp
from jax.experimental import pallas as pl
from jax.experimental.pallas import tpu as pltpu

BN_EPS = 1e-5


def _round_up(v: int, m: int) -> int:
    return (v + m - 1) // m * m


def _make_interp_matrix(l_in: int, l_out: int) -> np.ndarray:
    """(l_in, l_out) matrix G with  out = y @ G  ==
    F.interpolate(y, size=l_out, mode='linear', align_corners=True).
    Every column sums to 1 (needed for the BN-after-interp FMA fold)."""
    G = np.zeros((l_in, l_out), dtype=np.float32)
    if l_out == 1:
        G[0, 0] = 1.0
        return G
    scale = (l_in - 1) / (l_out - 1)
    for j in range(l_out):
        src = j * scale
        i0 = min(int(np.floor(src)), l_in - 1)
        i1 = min(i0 + 1, l_in - 1)
        w1 = src - i0
        G[i0, j] += 1.0 - w1
        G[i1, j] += w1
    return G


def _fusion_up_kernel(x_ref, w_ref, g_ref, params_ref, o_ref,
                      sum_ref, sumsq_ref, *, inv_count):
    p = pl.program_id(0)   # 0 = BN-stats phase, 1 = apply phase
    b = pl.program_id(1)   # batch tile

    # Conv1d(kernel_size=1) == channel-mixing matmul on the MXU.
    # bf16 operands, f32 accumulation.  Conv bias omitted: it cancels exactly
    # under training-mode BatchNorm (batch-mean subtraction).
    y = jnp.dot(w_ref[...], x_ref[...],
                preferred_element_type=jnp.float32)          # (Cout_p, L_p) f32

    @pl.when(p == 0)
    def _stats_phase():
        @pl.when(b == 0)
        def _init():
            sum_ref[...] = jnp.zeros_like(sum_ref)
            sumsq_ref[...] = jnp.zeros_like(sumsq_ref)
        # Zero-padded lanes / channels contribute nothing; the real element
        # count (inv_count) is used when forming mean/var below.
        sum_ref[...] = sum_ref[...] + jnp.sum(y, axis=1, keepdims=True)
        sumsq_ref[...] = sumsq_ref[...] + jnp.sum(y * y, axis=1, keepdims=True)

    @pl.when(p == 1)
    def _apply_phase():
        # Fold BatchNorm (training mode, biased batch variance) into one
        # per-channel scale/shift:  y_bn = y*s + t.
        mean = sum_ref[...] * inv_count                       # (Cout_p, 1) f32
        var = jnp.maximum(sumsq_ref[...] * inv_count - mean * mean, 0.0)
        gamma = params_ref[:, 0:1]                            # (Cout_p, 1)
        beta = params_ref[:, 1:2]                             # (Cout_p, 1)
        s = gamma * jax.lax.rsqrt(var + BN_EPS)
        t = beta - mean * s
        # Interp matmul on the raw conv output (MXU, bf16 in / f32 acc); BN is
        # a single FMA on the lane-dense result.  Valid because every real
        # column of G sums to 1:  (y*s + t) @ G == s*(y@G) + t.
        z = jnp.dot(y.astype(jnp.bfloat16), g_ref[...],
                    preferred_element_type=jnp.float32)       # (Cout_p, Lout_p)
        o_ref[...] = (z * s + t).astype(o_ref.dtype)


def fusion_up_block(x, conv_w, conv_b, bn_gamma, bn_beta, interpolate_size):
    """x: (N, Cin, L) f32.  conv_w: (Cout, Cin) (or PyTorch (Cout, Cin, 1)).
    conv_b / bn_gamma / bn_beta: (Cout,).  Training-mode BatchNorm (batch
    statistics), matching the PyTorch module's forward; under batch stats the
    conv bias cancels exactly and is not used inside the kernel."""
    x = jnp.asarray(x, jnp.float32)
    if conv_w.ndim == 3:                    # accept PyTorch Conv1d weight layout
        conv_w = conv_w[..., 0]
    del conv_b                              # cancels under training-mode BN

    n, c_in, l_in = x.shape
    c_out = int(conv_w.shape[0])
    l_out = int(interpolate_size)

    # ---- padding: lanes -> multiples of 128, channels -> multiples of 16 ----
    c_in_p = _round_up(c_in, 16)
    c_out_p = _round_up(c_out, 16)
    l_p = _round_up(l_in, 128)
    l_out_p = _round_up(l_out, 128)

    x_p = jnp.pad(x, ((0, 0), (0, c_in_p - c_in), (0, l_p - l_in))
                  ).astype(jnp.bfloat16)                       # (N, Cin_p, L_p)
    w_p = jnp.pad(conv_w.astype(jnp.float32),
                  ((0, c_out_p - c_out), (0, c_in_p - c_in))
                  ).astype(jnp.bfloat16)                       # (Cout_p, Cin_p)
    # gamma/beta as per-channel *columns* (the kernel's stats / broadcast
    # orientation); padded channels get gamma=0 -> scale 0 -> zero output rows.
    params = jnp.pad(
        jnp.stack([jnp.asarray(bn_gamma, jnp.float32),
                   jnp.asarray(bn_beta, jnp.float32)], axis=1),
        ((0, c_out_p - c_out), (0, 0)))                        # (Cout_p, 2)

    g = _make_interp_matrix(l_in, l_out)
    g_p = jnp.asarray(np.pad(g, ((0, l_p - l_in), (0, l_out_p - l_out))),
                      dtype=jnp.bfloat16)                      # (L_p, Lout_p)

    inv_count = 1.0 / float(n * l_in)       # real BN element count (N * L)
    kernel = functools.partial(_fusion_up_kernel, inv_count=inv_count)

    # Explicit VMEM budget: double-buffered pipelined blocks + resident
    # operands, with headroom, clamped to v7x's 64 MiB physical VMEM.
    blk_bytes = (2 * (c_in_p * l_p * 2)          # x block (bf16, double-buffered)
                 + 2 * (c_out_p * l_out_p * 4)   # out block (f32, double-buffered)
                 + c_out_p * c_in_p * 2          # W (resident)
                 + l_p * l_out_p * 2             # G (resident)
                 + c_out_p * 2 * 4               # gamma/beta
                 + 2 * c_out_p * 4)              # stats scratch
    vmem_limit = int(min(64 * 1024 * 1024, max(16 * 1024 * 1024, 4 * blk_bytes)))

    grid = (2, n)   # (phase, batch): phase 0 = BN stats, phase 1 = apply + interp

    out_p = pl.pallas_call(
        kernel,
        out_shape=jax.ShapeDtypeStruct((n, c_out_p, l_out_p), jnp.float32),
        grid_spec=pltpu.PrefetchScalarGridSpec(
            num_scalar_prefetch=0,
            grid=grid,
            in_specs=[
                # x: native (N, Cin, L) layout, one batch per grid step.
                pl.BlockSpec((pl.Squeezed(), c_in_p, l_p),
                             lambda p, b: (b, 0, 0)),
                # W, G, gamma/beta: constant block index -> DMA'd once, resident.
                pl.BlockSpec((c_out_p, c_in_p), lambda p, b: (0, 0)),
                pl.BlockSpec((l_p, l_out_p), lambda p, b: (0, 0)),
                pl.BlockSpec((c_out_p, 2), lambda p, b: (0, 0)),
            ],
            # b*p keeps the output block pinned at 0 during the stats phase
            # (p==0) so no garbage blocks are written back; phase 1 streams
            # one lane-dense (Cout_p, Lout_p) block per batch.
            out_specs=pl.BlockSpec((pl.Squeezed(), c_out_p, l_out_p),
                                   lambda p, b: (b * p, 0, 0)),
            scratch_shapes=[
                pltpu.VMEM((c_out_p, 1), jnp.float32),   # per-channel sum(y)
                pltpu.VMEM((c_out_p, 1), jnp.float32),   # per-channel sum(y*y)
            ],
        ),
        compiler_params=pltpu.CompilerParams(
            # Both axes 'arbitrary': phase-1 tiles depend on stats accumulated
            # over all batches in phase 0 (carried in VMEM scratch).
            dimension_semantics=("arbitrary", "arbitrary"),
            vmem_limit_bytes=vmem_limit,
        ),
    )(x_p, w_p, g_p, params)

    # Strip padding only — no transposes.
    return out_p[:, :c_out, :l_out]


def _reference(x, conv_w, conv_b, bn_gamma, bn_beta, interpolate_size):
    """Pure-JAX f32 reference mirroring the PyTorch forward (training-mode BN),
    including the conv bias (which must cancel under BN)."""
    y = jnp.einsum('oi,nil->nol', conv_w, x) + conv_b[None, :, None]
    mean = jnp.mean(y, axis=(0, 2), keepdims=True)
    var = jnp.mean((y - mean) ** 2, axis=(0, 2), keepdims=True)
    y = (y - mean) / jnp.sqrt(var + BN_EPS)
    y = y * bn_gamma[None, :, None] + bn_beta[None, :, None]

    l_in = x.shape[-1]
    l_out = interpolate_size
    scale = (l_in - 1) / (l_out - 1)
    src = jnp.arange(l_out, dtype=jnp.float32) * scale
    i0 = jnp.clip(jnp.floor(src).astype(jnp.int32), 0, l_in - 1)
    i1 = jnp.clip(i0 + 1, 0, l_in - 1)
    w1 = src - i0.astype(jnp.float32)
    w0 = 1.0 - w1
    return y[:, :, i0] * w0[None, None, :] + y[:, :, i1] * w1[None, None, :]


if __name__ == "__main__":
    # Small shapes consistent with the module: transformer features (N, Cin, L).
    N, C_IN, C_OUT, L, INTERP = 2, 8, 4, 16, 32

    key = jax.random.PRNGKey(0)
    kx, kw, kb, kg, kbeta = jax.random.split(key, 5)

    x = jax.random.normal(kx, (N, C_IN, L), dtype=jnp.float32)
    conv_w = jax.random.normal(kw, (C_OUT, C_IN), dtype=jnp.float32) * 0.1
    conv_b = jax.random.normal(kb, (C_OUT,), dtype=jnp.float32) * 0.1
    bn_gamma = 1.0 + 0.1 * jax.random.normal(kg, (C_OUT,), dtype=jnp.float32)
    bn_beta = 0.1 * jax.random.normal(kbeta, (C_OUT,), dtype=jnp.float32)

    out = fusion_up_block(x, conv_w, conv_b, bn_gamma, bn_beta, INTERP)
    out = jax.block_until_ready(out)

    ref = _reference(x, conv_w, conv_b, bn_gamma, bn_beta, INTERP)
    assert out.shape == (N, C_OUT, INTERP), out.shape
    # bf16 MXU operands (per perf guidance) with f32 accumulation / elementwise
    # math -> compare at a bf16-appropriate tolerance against the f32 reference.
    max_err = float(jnp.max(jnp.abs(out - ref)))
    assert jnp.allclose(out, ref, atol=5e-2, rtol=5e-2), f"max abs err {max_err}"

    print("KERNEL_OK")
</pallas_src>

<mosaic_0001>
module attributes {stable_mosaic.version = 11 : i64} {
  func.func @_fusion_up_kernel(%arg0: i32, %arg1: i32, %arg2: memref<1x16x128xbf16, #tpu.memory_space<vmem>>, %arg3: memref<16x16xbf16, #tpu.memory_space<vmem>>, %arg4: memref<128x128xbf16, #tpu.memory_space<vmem>>, %arg5: memref<16x2xf32, #tpu.memory_space<vmem>>, %arg6: memref<1x16x128xf32, #tpu.memory_space<vmem>>, %arg7: memref<16x1xf32, #tpu.memory_space<vmem>>, %arg8: memref<16x1xf32, #tpu.memory_space<vmem>>) attributes {dimension_semantics = [#tpu.dimension_semantics<arbitrary>, #tpu.dimension_semantics<arbitrary>], iteration_bounds = array<i64: 2, 2>, scalar_prefetch = 0 : i64, scratch_operands = 2 : i64, tpu.core_type = #tpu.core_type<tc>, window_params = [{transform_indices = @transform_0, window_bounds = array<i64: 1, 16, 128>}, {pipeline_mode = #tpu.pipeline_mode<synchronous>, transform_indices = @transform_1, window_bounds = array<i64: 16, 16>}, {pipeline_mode = #tpu.pipeline_mode<synchronous>, transform_indices = @transform_2, window_bounds = array<i64: 128, 128>}, {pipeline_mode = #tpu.pipeline_mode<synchronous>, transform_indices = @transform_3, window_bounds = array<i64: 16, 2>}, {transform_indices = @transform_4, window_bounds = array<i64: 1, 16, 128>}]} {
    %c0 = arith.constant 0 : index
    %c0_0 = arith.constant 0 : index
    %0 = vector.load %arg3[%c0, %c0_0] : memref<16x16xbf16, #tpu.memory_space<vmem>>, vector<16x16xbf16>
    %c0_1 = arith.constant 0 : index
    %c0_2 = arith.constant 0 : index
    %c0_3 = arith.constant 0 : index
    %1 = vector.load %arg2[%c0_1, %c0_2, %c0_3] : memref<1x16x128xbf16, #tpu.memory_space<vmem>>, vector<1x16x128xbf16>
    %2 = vector.shape_cast %1 : vector<1x16x128xbf16> to vector<16x128xbf16>
    %cst = arith.constant dense<0.000000e+00> : vector<16x128xf32>
    %3 = tpu.matmul %0, %2, %cst {dimension_numbers = #tpu.dot_dimension_numbers<[1], [0], [0], [1], [0, 0, 1, 1], [], []>} : vector<16x16xbf16>, vector<16x128xbf16>, vector<16x128xf32> -> vector<16x128xf32>
    %c0_i32 = arith.constant 0 : i32
    %4 = arith.cmpi eq, %arg0, %c0_i32 : i32
    %5 = arith.extui %4 : i1 to i32
    %c0_i32_4 = arith.constant 0 : i32
    %6 = arith.cmpi ne, %5, %c0_i32_4 : i32
    scf.if %6 {
      %c0_i32_6 = arith.constant 0 : i32
      %10 = arith.cmpi eq, %arg1, %c0_i32_6 : i32
      %11 = arith.extui %10 : i1 to i32
      %c0_i32_7 = arith.constant 0 : i32
      %12 = arith.cmpi ne, %11, %c0_i32_7 : i32
      scf.if %12 {
        %cst_18 = arith.constant 0.000000e+00 : f32
        %24 = vector.broadcast %cst_18 : f32 to vector<16x1xf32>
        %c0_19 = arith.constant 0 : index
        %c0_20 = arith.constant 0 : index
        %25 = vector.load %arg7[%c0_19, %c0_20] : memref<16x1xf32, #tpu.memory_space<vmem>>, vector<16x1xf32>
        tpu.vector_store %arg7[%c0_19, %c0_20], %24 {strides = array<i32>} : memref<16x1xf32, #tpu.memory_space<vmem>>, vector<16x1xf32>,
        %cst_21 = arith.constant 0.000000e+00 : f32
        %26 = vector.broadcast %cst_21 : f32 to vector<16x1xf32>
        %c0_22 = arith.constant 0 : index
        %c0_23 = arith.constant 0 : index
        %27 = vector.load %arg8[%c0_22, %c0_23] : memref<16x1xf32, #tpu.memory_space<vmem>>, vector<16x1xf32>
        tpu.vector_store %arg8[%c0_22, %c0_23], %26 {strides = array<i32>} : memref<16x1xf32, #tpu.memory_space<vmem>>, vector<16x1xf32>,
      } else {
      }
      %c0_8 = arith.constant 0 : index
      %c0_9 = arith.constant 0 : index
      %13 = vector.load %arg7[%c0_8, %c0_9] : memref<16x1xf32, #tpu.memory_space<vmem>>, vector<16x1xf32>
      %cst_10 = arith.constant dense<0.000000e+00> : vector<16xf32>
      %14 = vector.multi_reduction <add>, %3, %cst_10 [1] : vector<16x128xf32> to vector<16xf32>
      %15 = vector.shape_cast %14 : vector<16xf32> to vector<16x1xf32>
      %16 = arith.addf %13, %15 : vector<16x1xf32>
      %c0_11 = arith.constant 0 : index
      %c0_12 = arith.constant 0 : index
      %17 = vector.load %arg7[%c0_11, %c0_12] : memref<16x1xf32, #tpu.memory_space<vmem>>, vector<16x1xf32>
      tpu.vector_store %arg7[%c0_11, %c0_12], %16 {strides = array<i32>} : memref<16x1xf32, #tpu.memory_space<vmem>>, vector<16x1xf32>,
      %c0_13 = arith.constant 0 : index
      %c0_14 = arith.constant 0 : index
      %18 = vector.load %arg8[%c0_13, %c0_14] : memref<16x1xf32, #tpu.memory_space<vmem>>, vector<16x1xf32>
      %19 = arith.mulf %3, %3 : vector<16x128xf32>
      %cst_15 = arith.constant dense<0.000000e+00> : vector<16xf32>
      %20 = vector.multi_reduction <add>, %19, %cst_15 [1] : vector<16x128xf32> to vector<16xf32>
      %21 = vector.shape_cast %20 : vector<16xf32> to vector<16x1xf32>
      %22 = arith.addf %18, %21 : vector<16x1xf32>
      %c0_16 = arith.constant 0 : index
      %c0_17 = arith.constant 0 : index
      %23 = vector.load %arg8[%c0_16, %c0_17] : memref<16x1xf32, #tpu.memory_space<vmem>>, vector<16x1xf32>
      tpu.vector_store %arg8[%c0_16, %c0_17], %22 {strides = array<i32>} : memref<16x1xf32, #tpu.memory_space<vmem>>, vector<16x1xf32>,
    } else {
    }
    %c1_i32 = arith.constant 1 : i32
    %7 = arith.cmpi eq, %arg0, %c1_i32 : i32
    %8 = arith.extui %7 : i1 to i32
    %c0_i32_5 = arith.constant 0 : i32
    %9 = arith.cmpi ne, %8, %c0_i32_5 : i32
    scf.if %9 {
      %c0_6 = arith.constant 0 : index
      %c0_7 = arith.constant 0 : index
      %10 = vector.load %arg7[%c0_6, %c0_7] : memref<16x1xf32, #tpu.memory_space<vmem>>, vector<16x1xf32>
      %cst_8 = arith.constant 3.125000e-02 : f32
      %11 = vector.broadcast %cst_8 : f32 to vector<16x1xf32>
      %12 = arith.mulf %10, %11 : vector<16x1xf32>
      %c0_9 = arith.constant 0 : index
      %c0_10 = arith.constant 0 : index
      %13 = vector.load %arg8[%c0_9, %c0_10] : memref<16x1xf32, #tpu.memory_space<vmem>>, vector<16x1xf32>
      %cst_11 = arith.constant 3.125000e-02 : f32
      %14 = vector.broadcast %cst_11 : f32 to vector<16x1xf32>
      %15 = arith.mulf %13, %14 : vector<16x1xf32>
      %16 = arith.mulf %12, %12 : vector<16x1xf32>
      %17 = arith.subf %15, %16 : vector<16x1xf32>
      %cst_12 = arith.constant 0.000000e+00 : f32
      %18 = vector.broadcast %cst_12 : f32 to vector<16x1xf32>
      %19 = arith.maximumf %17, %18 : vector<16x1xf32>
      %c0_13 = arith.constant 0 : index
      %c0_14 = arith.constant 0 : index
      %20 = vector.load %arg5[%c0_13, %c0_14] : memref<16x2xf32, #tpu.memory_space<vmem>>, vector<16x1xf32>
      %c0_15 = arith.constant 0 : index
      %c1 = arith.constant 1 : index
      %21 = vector.load %arg5[%c0_15, %c1] : memref<16x2xf32, #tpu.memory_space<vmem>>, vector<16x1xf32>
      %cst_16 = arith.constant 9.99999974E-6 : f32
      %22 = vector.broadcast %cst_16 : f32 to vector<16x1xf32>
      %23 = arith.addf %19, %22 : vector<16x1xf32>
      %24 = math.rsqrt %23 : vector<16x1xf32>
      %25 = arith.mulf %20, %24 : vector<16x1xf32>
      %26 = arith.mulf %12, %25 : vector<16x1xf32>
      %27 = arith.subf %21, %26 : vector<16x1xf32>
      %28 = arith.truncf %3 : vector<16x128xf32> to vector<16x128xbf16>
      %c0_17 = arith.constant 0 : index
      %c0_18 = arith.constant 0 : index
      %29 = vector.load %arg4[%c0_17, %c0_18] : memref<128x128xbf16, #tpu.memory_space<vmem>>, vector<128x128xbf16>
      %cst_19 = arith.constant dense<0.000000e+00> : vector<16x128xf32>
      %30 = tpu.matmul %28, %29, %cst_19 {dimension_numbers = #tpu.dot_dimension_numbers<[1], [0], [0], [1], [0, 0, 1, 1], [], []>} : vector<16x128xbf16>, vector<128x128xbf16>, vector<16x128xf32> -> vector<16x128xf32>
      %31 = vector.broadcast %25 : vector<16x1xf32> to vector<16x128xf32>
      %32 = arith.mulf %30, %31 : vector<16x128xf32>
      %33 = vector.broadcast %27 : vector<16x1xf32> to vector<16x128xf32>
      %34 = arith.addf %32, %33 : vector<16x128xf32>
      %c0_20 = arith.constant 0 : index
      %c0_21 = arith.constant 0 : index
      %c0_22 = arith.constant 0 : index
      %35 = vector.load %arg6[%c0_20, %c0_21, %c0_22] : memref<1x16x128xf32, #tpu.memory_space<vmem>>, vector<1x16x128xf32>
      %36 = vector.shape_cast %35 : vector<1x16x128xf32> to vector<16x128xf32>
      %37 = vector.shape_cast %34 : vector<16x128xf32> to vector<1x16x128xf32>
      tpu.vector_store %arg6[%c0_20, %c0_21, %c0_22], %37 {strides = array<i32>} : memref<1x16x128xf32, #tpu.memory_space<vmem>>, vector<1x16x128xf32>,
    } else {
    }
    return
  }
  func.func @transform_0(%arg0: i32, %arg1: i32) -> (i32, i32, i32) {
    %c0_i32 = arith.constant 0 : i32
    %c0_i32_0 = arith.constant 0 : i32
    %c0_i32_1 = arith.constant 0 : i32
    return %arg1, %c0_i32, %c0_i32_0 : i32, i32, i32
  }
  func.func @transform_1(%arg0: i32, %arg1: i32) -> (i32, i32) {
    %c0_i32 = arith.constant 0 : i32
    %c0_i32_0 = arith.constant 0 : i32
    %c0_i32_1 = arith.constant 0 : i32
    return %c0_i32, %c0_i32_0 : i32, i32
  }
  func.func @transform_2(%arg0: i32, %arg1: i32) -> (i32, i32) {
    %c0_i32 = arith.constant 0 : i32
    %c0_i32_0 = arith.constant 0 : i32
    %c0_i32_1 = arith.constant 0 : i32
    return %c0_i32, %c0_i32_0 : i32, i32
  }
  func.func @transform_3(%arg0: i32, %arg1: i32) -> (i32, i32) {
    %c0_i32 = arith.constant 0 : i32
    %c0_i32_0 = arith.constant 0 : i32
    %c0_i32_1 = arith.constant 0 : i32
    return %c0_i32, %c0_i32_0 : i32, i32
  }
  func.func @transform_4(%arg0: i32, %arg1: i32) -> (i32, i32, i32) {
    %0 = arith.muli %arg1, %arg0 : i32
    %c0_i32 = arith.constant 0 : i32
    %c0_i32_0 = arith.constant 0 : i32
    %c0_i32_1 = arith.constant 0 : i32
    return %0, %c0_i32, %c0_i32_0 : i32, i32, i32
  }
}

</mosaic_0001>

<bundles_post_ra>
// kernel: tpu_custom_call.1
= control target key start
LH: loop header
LB: loop body
LE: loop exit
PB: predicated region body
PF: predicated region fallthrough
CT: control target
= control target key end

     0   :  { %9 = vsyncpa [#allocation5], 0  ;;  %s1245_s0 = inlined_call_operand.vmem [shape: bf16[2,16,128], index: 0, kind: input, shape index: {}]   ;;  %s1246_s1 = inlined_call_operand.hbm [shape: bf16[16,16], index: 1, kind: input, shape index: {}]   ;;  %s1247_s2 = inlined_call_operand.hbm [shape: bf16[128,128], index: 2, kind: input, shape index: {}]   ;;  %s1248_s3 = inlined_call_operand.vmem [shape: f32[16,2], index: 3, kind: input, shape index: {}]   ;;  %s1249_s4 = inlined_call_operand.hbm [shape: f32[2,16,128], index: 4, kind: output, shape index: {}]  }
   0x1   :  { %10 = vsyncpa [#allocation8], 0 }
   0x2   :  { %11 = vsyncpa [#allocation6], 0 }
   0x3   :  { %13 = vsyncpa [#allocation6 + $0x1], 0  ;;  %s1009_s15 = smov 0   ;;  %s1011_s16 = smov 0  }
   0x4   :  { %s1013_s17 = smov 0   ;;  %s1015_s18 = smov 0  }
   0x5   :  { %s1017_s19 = smov 0   ;;  %s1019_s20 = smov 0  }
   0x6   :  { %s1021_s21 = smov 0   ;;  %s1023_s22 = smov 0  }
   0x7 LB: > { %1257 = sst [smem:[#allocation13_spill]] %s963_s21  ;;  %s618_s23 = sadd.s32 4294967295, %s967_s22   ;;  %s967_s22 = sphi %s1023_s22, %s19_s22   ;;  %s963_s21 = sphi %s1021_s21, %s1271_s21   ;;  %s959_s20 = sphi %s1019_s20, %s1276_s20   ;;  %s955_s19 = sphi %s1017_s19, %s1269_s19   ;;  %s951_s18 = sphi %s1015_s18, %s1275_s18   ;;  %s947_s17 = sphi %s1013_s17, %s1274_s17   ;;  %s943_s16 = sphi %s1011_s16, %s1273_s16   ;;  %s939_s15 = sphi %s1009_s15, %s1272_s15  }
   0x8   : > { %s619_s24 = sadd.s32 4294967294, %s967_s22   ;;  %s28_s25 = sadd.s32 1, %s959_s20 }
   0x9   : > { %s31_s26 = sadd.s32 1, %s963_s21  ;;  %p29_p0 = scmp.ge.s32.totalorder %s28_s25, 2 }
   0xa   : > { %s124_s27 = smul.u32 %s959_s20, %s963_s21  ;;  %s129_s28 = sadd.s32 1, %s947_s17 }
   0xb   : > { %p139_p1 = scmp.ne.s32.totalorder %s947_s17, %s943_s16  ;;  %s1278_s25 = smov (%p29_p0, %s28_s25), 0 }
   0xc   : > { %1258 = sst [smem:[#allocation14_spill]] %s1278_s25  ;;  %s1280_s26 = smov (!%p29_p0, %s31_s26), %s963_s21 }
   0xd   : > { %p140_p2 = scmp.eq.s32.totalorder %s618_s23, 3  ;;  %p145_p3 = scmp.ne.s32.totalorder %s943_s16, %s939_s15 }
   0xe   : > { %p33_p4 = scmp.ge.s32.totalorder %s1280_s26, 2  ;;  %p146_p5 = scmp.eq.s32.totalorder %s619_s24, 3 }
   0xf   : > { %p1063_p6 = por %p140_p2, %p139_p1  ;;  %p620_p7 = scmp.ge.s32.totalorder %s967_s22, 1 }
  0x10   : > { %s1282_s26 = smov (%p33_p4, %s1280_s26), 0  ;;  %p1070_p8 = por %p146_p5, %p145_p3 }
  0x11   : > { %s1259_s29 = scalar_select %p1063_p6, 1, 0 }
  0x12   : > { %1260 = sst [smem:[#allocation15_spill]] %s1282_s26  ;;  %p153_p9 = scmp.lt.s32.totalorder %s967_s22, 5 }
  0x13   : > { %s1261_s30 = scalar_select %p1070_p8, 1, 0 }
  0x14   : > { %s125_s5 = smul.u32 %s1282_s26, %s1278_s25  ;;  %p1077_p10 = pnand %p620_p7, %p153_p9 }
  0x15   : > { %p1081_p11 = scmp.eq.s32.totalorder %s618_s23, 0  ;;  %s969_s9 = smov [#allocation4]  }
  0x16   : > { %s1262_s6 = scalar_select %p1077_p10, 1, 0 }
  0x17   : > { %s1263_s7 = scalar_select %p1081_p11, 1, 0 }
  0x18   : > { %s126_s8 = ssub.s32 %s124_s27, %s125_s5  ;;  %p698_p13 = pneg %p1077_p10 }
  0x19   : > { %p127_p12 = scmp.eq.s32.totalorder %s126_s8, 0  ;;  %s165_s10 = sshll.u32 %s969_s9, 4  ;;  %s166_s10 = int_to_ptr.vmem [resolvable:$true] %s165_s10 }
  0x1a   : > { %p1092_p0 = pnand %p1081_p11, %p698_p13  ;;  %s970_s13 = smov [#allocation7]  }
  0x1b   : > { %s1088_s11 = scalar_select %p127_p12, %s947_s17, %s129_s28  }
  0x1c   : > { %s178_s14 = sshll.u32 %s970_s13, 4  ;;  %s809_s27 = scalar_lea.hbm %s1246_s1, 128  ;;  %s179_s14 = int_to_ptr.vmem [resolvable:$true] %s178_s14 }
  0x1d   : > { %p810_p1 = scmp.ne.s32.totalorder %s1246_s1, %s809_s27  ;;  %p811_p2 = pneg %p1092_p0 }
  0x1e   : > { %p816_p5 = scmp.lt.u32.totalorder %s809_s27, %s1246_s1 }
  0x1f   : > { %p812_p3 = pnand %p811_p2, %p810_p1 }
  0x21   : > { %p813_p4 = pneg %p812_p3 }
  0x23   : > { %p818_p7 = pnand %p816_p5, %p813_p4 }
  0x25   : > { %821 = shalt.err (!%p818_p7)
}
  0x26   : > { %s822_s13 = scalar_lea.vmem %s166_s10, 128  ;;  %p830_p8 = scmp.lt.s32.totalorder %s166_s10, %s166_s10 }
  0x27   : > { %p823_p9 = scmp.ne.s32.totalorder %s166_s10, %s822_s13  ;;  %p831_p6 = scmp.lt.s32.totalorder %s822_s13, %s822_s13 }
  0x29   : > { %p825_p12 = pnand %p823_p9, %p811_p2  ;;  %p832_p11 = por %p831_p6, %p830_p8 }
  0x2b   : > { %p826_p13 = pneg %p825_p12 }
  0x2d   : > { %p833_p10 = pnand %p832_p11, %p826_p13 }
  0x2f   : > { %836 = shalt.err (!%p833_p10)
}
  0x30   : > { %s971_s23 = smov 64   ;;  %s972_s24 = smov 4  }
  0x31   : > { %701 = dma.hbm_to_vmem [thread:$0]  (!%p1092_p0), %s1246_s1, 128, %s166_s10, [#allocation5], %s971_s23, %s971_s23, %s972_s24  }
  0x32   : > { %s837_s9 = scalar_lea.hbm %s1247_s2, 1024 }
  0x33   : > { %p838_p6 = scmp.ne.s32.totalorder %s1247_s2, %s837_s9  ;;  %p844_p11 = scmp.lt.u32.totalorder %s837_s9, %s1247_s2 }
  0x35   : > { %p840_p8 = pnand %p838_p6, %p811_p2 }
  0x37   : > { %p841_p10 = pneg %p840_p8 }
  0x39   : > { %p846_p1 = pnand %p844_p11, %p841_p10 }
  0x3b   : > { %849 = shalt.err (!%p846_p1)
}
  0x3c   : > { %s850_s10 = scalar_lea.vmem %s179_s14, 1024  ;;  %p858_p7 = scmp.lt.s32.totalorder %s179_s14, %s179_s14 }
  0x3d   : > { %p851_p3 = scmp.ne.s32.totalorder %s179_s14, %s850_s10  ;;  %p859_p9 = scmp.lt.s32.totalorder %s850_s10, %s850_s10 }
  0x3f   : > { %p853_p4 = pnand %p851_p3, %p811_p2  ;;  %p860_p12 = por %p859_p9, %p858_p7 }
  0x41   : > { %p854_p5 = pneg %p853_p4 }
  0x43   : > { %p861_p13 = pnand %p860_p12, %p854_p5 }
  0x45   : > { %864 = shalt.err (!%p861_p13)
}
  0x46   : > { %704 = dma.hbm_to_vmem [thread:$0]  (!%p1092_p0), %s1247_s2, 1024, %s179_s14, [#allocation8], %s971_s23, %s971_s23, %s972_s24  }
  0x47   : > { %p1265_p6 = scmp.ne.s32.totalorder %s1262_s6, 0 }
  0x48   : > { %p1266_p8 = scmp.ne.s32.totalorder (!%p1265_p6), %s1263_s7, 0 }
  0x49   : > { %205 = sbr.rel (%p1265_p6) target bundleno = 772 (0x304), region = 36 }
  0x50   : > { %926 = dma.done.wait (%p1266_p8), [#allocation5], 128  }
  0x51   : > { %928 = vsyncadd (%p1266_p8), [#allocation5], 4294967168 }
  0x52   : > { %930 = dma.done.wait (%p1266_p8), [#allocation8], 1024  }
  0x53   : > { %932 = vsyncadd (%p1266_p8), [#allocation8], 4294966272  ;;  %s232_s21 = sand.u32 1, %s943_s16   ;;  %p235_p0 = scmp.lt.s32.totalorder %s951_s18, 1  ;;  %v973_v0 = vmov 0.0   ;;  %vm974_vm0 = vmmov 0  }
  0x54   : > { %s627_s6 = sshll.u32 %s232_s21, 4  ;;  %662 = vmatprep.subr.bf16.mxu0 %v973_v0  ;;  %664 = vmatprep.mubr.msk.bf16.mxu0 %vm974_vm0, %v973_v0  ;;  %v793_v2 = vld [vmem:[#allocation4] sm:$0xff]   ;;  %vm257_vm1 = vcmask 130048   ;;  %p633_p2 = scmp.ne.s32.totalorder %s955_s19, 0 }
  0x55   : > { %s236_s12 = scalar_select %p235_p0, %s951_s18, 1 }
  0x56   : > { %s1160_s7 = scalar_lea.vmem [#allocation9], %s627_s6  ;;  %p634_p10 = scmp.ne.s32.totalorder (!%p633_p2), %s951_s18, 0 }
  0x57   : > { %s649_s14 = sshll.u32 %s236_s12, 3 }
  0x58   : > { %s239_s27 = scalar_lea.vmem %s1245_s0, %s649_s14 }
  0x59   : > { %v792_v1 = vld [vmem:[%s239_s27] sm:$0xff]  }
  0x5a   : > { %663 = vmatpush3.bf16.msra.mxu0 %v792_v1 }
  0x5d   : > { %665 = vmatmul.mubr.msk.bf16.vlgmr.msra.gmra.mrb[0].mxu0 %vm257_vm1, %v793_v2 }
 0x12d   : > { %305 = sbr.rel (%p633_p2) target bundleno = 466 (0x1d2), region = 48 }
 0x130   : > { %v1156_v3 = vpop.f32.mrb[0].mxu0 }
 0x131   : > { %v666_v4 = vpop.f32.mrb[1].mxu0 }
 0x132   : > { %v1158_v5 = vpop.f32.mrb[2].mxu0 }
 0x133   : > { %v667_v6 = vpop.f32.mrb[3].mxu0 }
 0x134   : > { %309 = sbr.rel (%p634_p10) target bundleno = 315 (0x13b), region = 52  ;;  %vm310_vm2 = vcmask (!%p634_p10), 7168   ;;  %v975_v7 = vmov (!%p634_p10), 0.0  }
 0x135   : > { %311 = vst.msk [vmem:[#allocation2] sm:$0xff] (!%p634_p10), %vm310_vm2, %v975_v7  ;;  %312 = vst.msk [vmem:[#allocation2 + $0x8] sm:$0xff] (!%p634_p10), %vm310_vm2, %v975_v7 }
 0x136   : > { %313 = vst.msk [vmem:[#allocation3] sm:$0xff] (!%p634_p10), %vm310_vm2, %v975_v7  ;;  %314 = vst.msk [vmem:[#allocation3 + $0x8] sm:$0xff] (!%p634_p10), %vm310_vm2, %v975_v7 }
 0x13b PF: > { %317 = vadd.xlane.f32.xlu0 %v1156_v3  ;;  %v328_v8 = vmul.f32 %v1156_v3, %v1156_v3  ;;  %v329_v9 = vmul.f32 %v1158_v5, %v1158_v5  ;;  %vm323_vm3 = vcmask 7168  }
 0x13c   : > { %v315_v10 = vld [vmem:[#allocation2] sm:$0xff]  ;;  %v316_v15 = vld [vmem:[#allocation2 + $0x8] sm:$0xff] }
 0x13d   : > { %330 = vadd.xlane.f32.xlu1 %v328_v8  ;;  %v326_v12 = vld [vmem:[#allocation3] sm:$0xff]  ;;  %v327_v18 = vld [vmem:[#allocation3 + $0x8] sm:$0xff] }
 0x13f   : > { %319 = vadd.xlane.f32.xlu0 %v1158_v5 }
 0x141   : > { %332 = vadd.xlane.f32.xlu1 %v329_v9 }
 0x1c8   : > { %v318_v11 = vpop.xlane.xlu0 %317 }
 0x1c9   : > { %v321_v13 = vadd.f32 %v318_v11, %v315_v10 }
 0x1ca   : > { %v331_v14 = vpop.xlane.xlu1 %330 }
 0x1cb   : > { %324 = vst.msk [vmem:[#allocation2] sm:$0xff] %vm323_vm3, %v321_v13  ;;  %v334_v16 = vadd.f32 %v331_v14, %v326_v12 }
 0x1cc   : > { %v320_v17 = vpop.xlane.xlu0 %319 }
 0x1cd   : > { %336 = vst.msk [vmem:[#allocation3] sm:$0xff] %vm323_vm3, %v334_v16  ;;  %v322_v19 = vadd.f32 %v320_v17, %v316_v15 }
 0x1ce   : > { %v333_v20 = vpop.xlane.xlu1 %332 }
 0x1cf   : > { %325 = vst.msk [vmem:[#allocation2 + $0x8] sm:$0xff] %vm323_vm3, %v322_v19  ;;  %v335_v21 = vadd.f32 %v333_v20, %v327_v18 }
 0x1d1   : > { %337 = vst.msk [vmem:[#allocation3 + $0x8] sm:$0xff] %vm323_vm3, %v335_v21 }
 0x1d2 PF: > { %p635_p11 = scmp.ne.s32.totalorder %s955_s19, 1 }
 0x1d3   : > { %v797_v22 = vld [vmem:[#allocation7] sm:$0xff] (!%p635_p11)   ;;  %v976_v23 = vmov (!%p635_p11), 0.0   ;;  %v798_v24 = vld [vmem:[#allocation7 + $0x8] sm:$0xff] (!%p635_p11)   ;;  %v342_v25 = vld [vmem:[#allocation2] sm:$0xff] (!%p635_p11)  ;;  %vm977_vm4 = vmmov (!%p635_p11), 0   ;;  %v978_v31 = vmov (!%p635_p11), 0   ;;  %v376_v57 = vpack.c.bf16 (!%p635_p11), %v1158_v5, %v1156_v3 }
 0x1d4   : > { %341 = sbr.rel (%p635_p11) target bundleno = 745 (0x2e9), region = 56  ;;  %668 = vmatprep.subr.bf16.mxu0 (!%p635_p11), %v976_v23  ;;  %v346_v26 = vld [vmem:[#allocation3] sm:$0xff] (!%p635_p11)  ;;  %v344_v27 = vmul.f32 (!%p635_p11), 0.03125, %v342_v25  ;;  %684 = vmatprep.mubr.msk.bf16.mxu0 (!%p635_p11), %vm977_vm4, %v976_v23  ;;  %v799_v33 = vld [vmem:[#allocation7 + $0x10] sm:$0xff] (!%p635_p11)   ;;  %v800_v40 = vld [vmem:[#allocation7 + $0x18] sm:$0xff] (!%p635_p11)   ;;  %v979_v45 = vmov (!%p635_p11), 1  }
 0x1d5   : > { %669 = vmatpush3.bf16.msra.mxu0 (!%p635_p11), %v797_v22  ;;  %v348_v28 = vmul.f32 (!%p635_p11), 0.03125, %v346_v26  ;;  %794 = vset.pattern.permute.xlu1 (!%p635_p11), %v978_v31  ;;  %v801_v44 = vld [vmem:[#allocation7 + $0x20] sm:$0xff] (!%p635_p11)   ;;  %v802_v46 = vld [vmem:[#allocation7 + $0x28] sm:$0xff] (!%p635_p11)   ;;  %v356_v47 = vld [vmem:[%s1248_s3] sm:$0xff] (!%p635_p11)  ;;  %s980_s13 = smov (!%p635_p11), 1  }
 0x1d6   : > { %670 = vmatprep.subr.bf16.mxu0 (!%p635_p11), %v976_v23  ;;  %v343_v29 = vld [vmem:[#allocation2 + $0x8] sm:$0xff] (!%p635_p11)  ;;  %v350_v32 = vmul.f32 (!%p635_p11), %v344_v27, %v344_v27  ;;  %795 = vset.pattern.permute.xlu0 (!%p635_p11), %v979_v45  ;;  %v803_v48 = vld [vmem:[#allocation7 + $0x30] sm:$0xff] (!%p635_p11)   ;;  %v804_v55 = vld [vmem:[#allocation7 + $0x38] sm:$0xff] (!%p635_p11)  }
 0x1d7   : > { %v345_v34 = vmul.f32 (!%p635_p11), 0.03125, %v343_v29  ;;  %v357_v50 = vld [vmem:[%s1248_s3 + $0x8] sm:$0xff] (!%p635_p11) }
 0x1d8   : > { %v347_v30 = vld [vmem:[#allocation3 + $0x8] sm:$0xff] (!%p635_p11)  ;;  %v352_v36 = vsub.f32 (!%p635_p11), %v348_v28, %v350_v32 }
 0x1d9   : > { %v349_v35 = vmul.f32 (!%p635_p11), 0.03125, %v347_v30  ;;  %671 = vmatpush3.bf16.msra.mxu0 (!%p635_p11), %v798_v24  ;;  %v351_v37 = vmul.f32 (!%p635_p11), %v345_v34, %v345_v34 }
 0x1da   : > { %672 = vmatprep.subr.bf16.mxu0 (!%p635_p11), %v976_v23  ;;  %v354_v38 = vmax.f32 (!%p635_p11), %v352_v36, 0.0 }
 0x1db   : > { %v353_v39 = vsub.f32 %v349_v35, %v351_v37 }
 0x1dc   : > { %v358_v41 = vadd.f32 1e-05, %v354_v38 }
 0x1dd   : > { %673 = vmatpush3.bf16.msra.mxu0 %v799_v33  ;;  %v355_v42 = vmax.f32 %v353_v39, 0.0 }
 0x1de   : > { %674 = vmatprep.subr.bf16.mxu0 %v976_v23  ;;  %805 = vrsqrt.f32 %v358_v41 }
 0x1df   : > { %v359_v43 = vadd.f32 1e-05, %v355_v42 }
 0x1e1   : > { %675 = vmatpush3.bf16.msra.mxu0 %v800_v40  ;;  %807 = vrsqrt.f32 %v359_v43 }
 0x1e2   : > { %676 = vmatprep.subr.bf16.mxu0 %v976_v23 }
 0x1e5   : > { %677 = vmatpush3.bf16.msra.mxu0 %v801_v44 }
 0x1e6   : > { %678 = vmatprep.subr.bf16.mxu0 %v976_v23 }
 0x1e8   : > { %v806_v49 = vpop.eup %805 }
 0x1e9   : > { %679 = vmatpush3.bf16.msra.mxu0 %v802_v46  ;;  %v362_v51 = vmul.f32 %v806_v49, %v356_v47 }
 0x1ea   : > { %680 = vmatprep.subr.bf16.mxu0 %v976_v23 }
 0x1eb   : > { %v808_v52 = vpop.eup %807  ;;  %v364_v53 = vmul.f32 %v362_v51, %v344_v27  ;;  %484 = vperm.xlu1 %794, %v362_v51  }
 0x1ec   : > { %v363_v54 = vmul.f32 %v808_v52, %v357_v50 }
 0x1ed   : > { %681 = vmatpush3.bf16.msra.mxu0 %v803_v48  ;;  %368 = vrot.lane.b32.xlu0 %v364_v53, %s980_s13 }
 0x1ee   : > { %682 = vmatprep.subr.bf16.mxu0 %v976_v23  ;;  %v365_v56 = vmul.f32 %v363_v54, %v345_v34 }
 0x1ef   : > { %489 = vperm.xlu1 %794, %v363_v54  }
 0x1f1   : > { %683 = vmatpush3.bf16.msra.mxu0 %v804_v55  ;;  %370 = vrot.lane.b32.xlu0 %v365_v56, %s980_s13 }
 0x1f3   : > { %796 = vset.pattern.permute.xlu1 %v979_v45 }
 0x1f4   : > { %685 = vmatmul.mubr.bf16.vlgmr.msra.gmra.mrb[0].mxu0 %v376_v57 }
 0x25f   : > { %v369_v58 = vpop.permute.xlu0 %368 }
 0x260   : > { %v374_v59 = vsub.f32 %v356_v47, %v369_v58 }
 0x262   : > { %496 = vperm.xlu0 %795, %v374_v59  }
 0x263   : > { %v371_v60 = vpop.permute.xlu0 %370 }
 0x264   : > { %v375_v61 = vsub.f32 %v357_v50, %v371_v60 }
 0x266   : > { %501 = vperm.xlu1 %796, %v375_v61  }
 0x26a   : > { %v485_v2 = vpop.permute.xlu1 %484 }
 0x26e   : > { %v490_v3 = vpop.permute.xlu1 %489 }
 0x2c7   : > { %v475_v62 = vpop.f32.mrb[0].mxu0 }
 0x2c8   : > { %v686_v63 = vpop.f32.mrb[1].mxu0  ;;  %v492_v4 = vmul.f32 %v485_v2, %v475_v62 }
 0x2c9   : > { %v478_v0 = vpop.f32.mrb[2].mxu0 }
 0x2ca   : > { %v687_v1 = vpop.f32.mrb[3].mxu0  ;;  %v493_v7 = vmul.f32 %v490_v3, %v478_v0 }
 0x2e1   : > { %v497_v5 = vpop.permute.xlu0 %496 }
 0x2e2   : > { %v504_v6 = vadd.f32 %v497_v5, %v492_v4 }
 0x2e4   : > { %506 = vst [vmem:[%s1160_s7] sm:$0xff] %v504_v6 }
 0x2e5   : > { %v502_v8 = vpop.permute.xlu1 %501 }
 0x2e6   : > { %v505_v9 = vadd.f32 %v502_v8, %v493_v7 }
 0x2e8   : > { %507 = vst [vmem:[%s1160_s7 + $0x8] sm:$0xff] %v505_v9 }
 0x2e9 PF: > { %s516_s10 = smul.u32 %s951_s18, %s955_s19  ;;  %s523_s25 = sshll.u32 %s1160_s7, 4  ;;  %s1184_s25 = int_to_ptr.vmem [resolvable:$true] %s523_s25 }
 0x2ea   : > { %s1193_s23 = scalar_lea.sflag [#allocation6], %s232_s21  ;;  %s865_s24 = scalar_lea.vmem %s1184_s25, 256 }
 0x2eb   : > { %s650_s26 = sshll.u32 %s516_s10, 8  ;;  %p866_p1 = scmp.ne.s32.totalorder %s1184_s25, %s865_s24 }
 0x2ec   : > { %s1189_s14 = scalar_lea.hbm %s1249_s4, %s650_s26  ;;  %p1267_p3 = scmp.ne.s32.totalorder %s1259_s29, 0 }
 0x2ed   : > { %s981_s18 = smov [#allocation9]  }
 0x2ee   : > { %p867_p4 = pnand %p866_p1, %p1267_p3  ;;  %s869_s19 = sshll.u32 %s981_s18, 4  ;;  %s870_s19 = int_to_ptr.vmem [resolvable:$false] %s869_s19 }
 0x2ef   : > { %s871_s27 = scalar_lea.vmem %s870_s19, 512  ;;  %p872_p7 = scmp.lt.s32.totalorder %s1184_s25, %s870_s19 }
 0x2f0   : > { %p868_p5 = pneg %p867_p4  ;;  %p873_p9 = scmp.lt.s32.totalorder %s871_s27, %s865_s24 }
 0x2f2   : > { %p874_p12 = por %p873_p9, %p872_p7 }
 0x2f4   : > { %p875_p13 = pnand %p874_p12, %p868_p5 }
 0x2f6   : > { %878 = shalt.err (!%p875_p13)
}
 0x2f7   : > { %s879_s21 = scalar_lea.hbm %s1189_s14, 256  ;;  %s883_s8 = scalar_lea.hbm %s1249_s4, 512 }
 0x2f8   : > { %p880_p6 = scmp.ne.s32.totalorder %s1189_s14, %s879_s21  ;;  %p884_p2 = scmp.lt.u32.totalorder %s1189_s14, %s1249_s4 }
 0x2f9   : > { %p885_p10 = scmp.lt.u32.totalorder %s883_s8, %s879_s21  ;;  %p887_p1 = scmp.lt.u32.totalorder %s879_s21, %s1189_s14 }
 0x2fa   : > { %p881_p8 = pnand %p880_p6, %p1267_p3 }
 0x2fb   : > { %p886_p11 = por %p885_p10, %p884_p2 }
 0x2fc   : > { %p882_p0 = pneg %p881_p8 }
 0x2fd   : > { %p888_p4 = por %p887_p1, %p886_p11 }
 0x2ff   : > { %p889_p5 = pnand %p888_p4, %p882_p0 }
 0x301   : > { %892 = shalt.err (!%p889_p5)
}
 0x302   : > { %s982_s13 = smov 128   ;;  %s983_s10 = smov 8  }
 0x303   : > { %696 = dma.vmem_to_hbm [thread:$0]  (%p1267_p3), %s1184_s25, 256, %s1189_s14, %s1193_s23, %s982_s13, %s982_s13, %s983_s10  }
 0x304 PF: > { %p713_p7 = scmp.ge.s32.totalorder %s967_s22, 2  ;;  %s538_s26 = sand.u32 1, %s939_s15  }
 0x305   : > { %p1268_p9 = scmp.ne.s32.totalorder %s1261_s30, 0  ;;  %s539_s6 = scalar_lea.sflag [#allocation6], %s538_s26 }
 0x307   : > { %p706_p12 = pnand %p713_p7, %p1268_p9 }
 0x309   : > { %934 = dma.done.wait (!%p706_p12), %s539_s6, 256  }
 0x30a   : > { %936 = vsyncadd (!%p706_p12), %s539_s6, 4294967040  ;;  %s19_s22 = sadd.s32 1, %s967_s22   ;;  %s1269_s19 = sld [smem:[#allocation13_spill]] }
 0x30b   : > { %p16_p13 = scmp.ge.s32.totalorder %s19_s22, 6   ;;  %s1270_s29 = sld [smem:[#allocation14_spill]] }
 0x30c   : > { %s1271_s21 = sld [smem:[#allocation15_spill]]  ;;  %s1272_s15 = smov %s943_s16 }
 0x30d   : > { %s1273_s16 = smov %s947_s17  ;;  %s1274_s17 = smov %s1088_s11 }
 0x30e   : > { %s1275_s18 = smov %s959_s20  ;;  %18 = sbr.rel (!%p16_p13) target bundleno = 7 (0x7), region = 92 }
 0x311   : > { %s1276_s20 = smov %s1270_s29 }
 0x315   :  { %544 = vsyncpa [#allocation5], 1 }
 0x316   :  { %546 = vsyncpa [#allocation5 + $0x1], 1 }
 0x317   :  { %547 = vsyncpa [#allocation8], 1 }
 0x318   :  { %548 = vsyncpa [#allocation6], 1 }
 0x319   :  { %550 = vsyncpa [#allocation6 + $0x1], 1 }

</bundles_post_ra>
